<compile_context>
chip_gen: v7x
topology: tpu7x:2x2x1
jax: 0.10.0
libtpu: 0.0.40
codegen_flags: <defaults>
</compile_context>

<pallas_src>
import jax
import jax.numpy as jnp
from jax.experimental import pallas as pl
from jax.experimental.pallas import tpu as pltpu

EMBED = 100          # embed_size
IN_DIM = 2 * EMBED   # 200
H1 = 500
H2 = 200
OUT = 100

# lane-padded (multiple-of-128) feature dims
IN_P = 256
H1_P = 512
H2_P = 256
OUT_P = 128

NEG_SLOPE = 0.01     # nn.LeakyReLU default


def _leaky_relu(x):
    return jnp.where(x > 0, x, NEG_SLOPE * x)


def mlp_kernel(x_ref, w1_ref, b1_ref, w2_ref, b2_ref, w3_ref, b3_ref, avg_ref,
               o_ref):
    # x_ref: (TM, IN_P) bf16 -- TB batch elements * N rows each, lane-padded.
    x = x_ref[...]
    h1 = jnp.dot(x, w1_ref[...], preferred_element_type=jnp.float32)
    h1 = _leaky_relu(h1 + b1_ref[...])                                  # (TM, H1_P) f32
    h2 = jnp.dot(h1.astype(jnp.bfloat16), w2_ref[...],
                 preferred_element_type=jnp.float32)
    h2 = _leaky_relu(h2 + b2_ref[...])                                  # (TM, H2_P) f32
    h3 = jnp.dot(h2.astype(jnp.bfloat16), w3_ref[...],
                 preferred_element_type=jnp.float32) + b3_ref[...]      # (TM, OUT_P) f32
    # torch.mean(x, 1) per batch element, as a block-diagonal averaging matmul.
    o_ref[...] = jnp.dot(avg_ref[...], h3,
                         preferred_element_type=jnp.float32)            # (TB, OUT_P)


def _choose_tb(batch, n, target_rows=512):
    """Rows-per-step tile: ~512 rows (fits well under the v7x 64 MiB VMEM too)."""
    tb = max(1, target_rows // n)
    if tb >= batch:
        return batch                       # single grid step; blocks == full dims
    return max(8, (tb // 8) * 8)           # keep sublane-aligned output blocks


@jax.jit
def mlp_forward(x, w1, b1, w2, b2, w3, b3):
    # x: (B, N, IN_DIM) f32  ->  (B, OUT) f32  == mean_N(MLP(x))
    B, n, _ = x.shape
    TB = _choose_tb(B, n)
    B_pad = -(-B // TB) * TB
    TM = TB * n

    # Flatten rows, zero-pad lanes + batch rows, cast MXU inputs to bf16.
    x_flat = x.reshape(B * n, IN_DIM)
    x_flat = jnp.pad(x_flat, ((0, (B_pad - B) * n), (0, IN_P - IN_DIM)))
    x_bf = x_flat.astype(jnp.bfloat16)

    w1p = jnp.pad(w1, ((0, IN_P - IN_DIM), (0, H1_P - H1))).astype(jnp.bfloat16)
    w2p = jnp.pad(w2, ((0, H1_P - H1), (0, H2_P - H2))).astype(jnp.bfloat16)
    w3p = jnp.pad(w3, ((0, H2_P - H2), (0, OUT_P - OUT))).astype(jnp.bfloat16)
    b1p = jnp.pad(b1, ((0, 0), (0, H1_P - H1)))       # padded bias cols stay 0
    b2p = jnp.pad(b2, ((0, 0), (0, H2_P - H2)))
    b3p = jnp.pad(b3, ((0, 0), (0, OUT_P - OUT)))

    # Block-diagonal averaging matrix: out[b] = (1/N) * sum_n h3[b*N + n].
    row = jnp.arange(TB, dtype=jnp.int32)[:, None]
    col = jnp.arange(TM, dtype=jnp.int32)[None, :]
    avg = jnp.where(col // n == row, 1.0 / n, 0.0).astype(jnp.float32)

    out = pl.pallas_call(
        mlp_kernel,
        out_shape=jax.ShapeDtypeStruct((B_pad, OUT_P), jnp.float32),
        grid_spec=pltpu.PrefetchScalarGridSpec(
            num_scalar_prefetch=0,
            grid=(B_pad // TB,),
            in_specs=[
                pl.BlockSpec((TM, IN_P), lambda i: (i, 0)),
                pl.BlockSpec((IN_P, H1_P), lambda i: (0, 0)),
                pl.BlockSpec((1, H1_P), lambda i: (0, 0)),
                pl.BlockSpec((H1_P, H2_P), lambda i: (0, 0)),
                pl.BlockSpec((1, H2_P), lambda i: (0, 0)),
                pl.BlockSpec((H2_P, OUT_P), lambda i: (0, 0)),
                pl.BlockSpec((1, OUT_P), lambda i: (0, 0)),
                pl.BlockSpec((TB, TM), lambda i: (0, 0)),
            ],
            out_specs=pl.BlockSpec((TB, OUT_P), lambda i: (i, 0)),
        ),
        compiler_params=pltpu.CompilerParams(
            dimension_semantics=("parallel",),
        ),
    )(x_bf, w1p, b1p, w2p, b2p, w3p, b3p, avg)

    return out[:B, :OUT]


def xavier_normal(key, fan_in, fan_out):
    std = (2.0 / (fan_in + fan_out)) ** 0.5
    return std * jax.random.normal(key, (fan_in, fan_out), dtype=jnp.float32)


def init_params(key):
    k1, k2, k3, k4, k5, k6 = jax.random.split(key, 6)
    w1 = xavier_normal(k1, IN_DIM, H1)
    w2 = xavier_normal(k2, H1, H2)
    w3 = xavier_normal(k3, H2, OUT)
    # PyTorch Linear bias default init ~ U(-1/sqrt(fan_in), 1/sqrt(fan_in))
    b1 = jax.random.uniform(k4, (1, H1), jnp.float32,
                            -1.0 / IN_DIM ** 0.5, 1.0 / IN_DIM ** 0.5)
    b2 = jax.random.uniform(k5, (1, H2), jnp.float32,
                            -1.0 / H1 ** 0.5, 1.0 / H1 ** 0.5)
    b3 = jax.random.uniform(k6, (1, OUT), jnp.float32,
                            -1.0 / H2 ** 0.5, 1.0 / H2 ** 0.5)
    return w1, b1, w2, b2, w3, b3


def embedding_pre(trips, ent_table, rel_table):
    # trips: (B, N, 3) int32 of (head, relation, tail) indices.
    h = ent_table[trips[..., 0]]                  # (B, N, E)
    t = ent_table[trips[..., 2]]                  # (B, N, E)
    r = rel_table[trips[..., 1]]                  # (B, N, E)
    ent_pair = jnp.stack([h, t], axis=2)          # (B, N, 2, E)
    return ent_pair, r


def pretrain_forward(trips, ent_table, rel_table, mlp_params):
    ent_pair, rel = embedding_pre(trips, ent_table, rel_table)
    B, N = ent_pair.shape[0], ent_pair.shape[1]
    x = ent_pair.reshape(B, N, IN_DIM)            # view(size[0], size[1], -1)
    rel_ = mlp_forward(x, *mlp_params)            # (B, OUT)
    return rel, rel_


if __name__ == "__main__":
    key = jax.random.PRNGKey(0)
    k_params, k_ent, k_rel, k_trip = jax.random.split(key, 4)

    mlp_params = init_params(k_params)

    NUM_ENT, NUM_REL = 16, 8
    B, N = 4, 8
    ent_table = jax.random.normal(k_ent, (NUM_ENT, EMBED), dtype=jnp.float32)
    rel_table = jax.random.normal(k_rel, (NUM_REL, EMBED), dtype=jnp.float32)

    trips = jnp.stack(
        [
            jax.random.randint(jax.random.fold_in(k_trip, 0), (B, N), 0, NUM_ENT),
            jax.random.randint(jax.random.fold_in(k_trip, 1), (B, N), 0, NUM_REL),
            jax.random.randint(jax.random.fold_in(k_trip, 2), (B, N), 0, NUM_ENT),
        ],
        axis=-1,
    ).astype(jnp.int32)                            # (B, N, 3)

    rel, rel_ = pretrain_forward(trips, ent_table, rel_table, mlp_params)
    jax.block_until_ready((rel, rel_))

    # Reference using the same bf16 MXU-input casts as the kernel (f32 accumulate).
    ent_pair, _ = embedding_pre(trips, ent_table, rel_table)
    x = ent_pair.reshape(B, N, IN_DIM)
    w1, b1, w2, b2, w3, b3 = mlp_params
    xb = x.reshape(B * N, IN_DIM).astype(jnp.bfloat16)
    h1 = _leaky_relu(jnp.dot(xb, w1.astype(jnp.bfloat16),
                             preferred_element_type=jnp.float32) + b1)
    h2 = _leaky_relu(jnp.dot(h1.astype(jnp.bfloat16), w2.astype(jnp.bfloat16),
                             preferred_element_type=jnp.float32) + b2)
    h3 = jnp.dot(h2.astype(jnp.bfloat16), w3.astype(jnp.bfloat16),
                 preferred_element_type=jnp.float32) + b3
    ref = h3.reshape(B, N, OUT).mean(axis=1)
    assert jnp.allclose(rel_, ref, atol=1e-2, rtol=1e-2), "mismatch vs reference"

    print("KERNEL_OK")
</pallas_src>

<mosaic_0001>
module attributes {stable_mosaic.version = 11 : i64} {
  func.func @mlp_kernel(%arg0: i32, %arg1: memref<32x256xbf16, #tpu.memory_space<vmem>>, %arg2: memref<256x512xbf16, #tpu.memory_space<vmem>>, %arg3: memref<1x512xf32, #tpu.memory_space<vmem>>, %arg4: memref<512x256xbf16, #tpu.memory_space<vmem>>, %arg5: memref<1x256xf32, #tpu.memory_space<vmem>>, %arg6: memref<256x128xbf16, #tpu.memory_space<vmem>>, %arg7: memref<1x128xf32, #tpu.memory_space<vmem>>, %arg8: memref<4x32xf32, #tpu.memory_space<vmem>>, %arg9: memref<4x128xf32, #tpu.memory_space<vmem>>) attributes {dimension_semantics = [#tpu.dimension_semantics<parallel>], iteration_bounds = array<i64: 1>, scalar_prefetch = 0 : i64, scratch_operands = 0 : i64, tpu.core_type = #tpu.core_type<tc>, window_params = [{transform_indices = @transform_0, window_bounds = array<i64: 32, 256>}, {pipeline_mode = #tpu.pipeline_mode<synchronous>, transform_indices = @transform_1, window_bounds = array<i64: 256, 512>}, {pipeline_mode = #tpu.pipeline_mode<synchronous>, transform_indices = @transform_2, window_bounds = array<i64: 1, 512>}, {pipeline_mode = #tpu.pipeline_mode<synchronous>, transform_indices = @transform_3, window_bounds = array<i64: 512, 256>}, {pipeline_mode = #tpu.pipeline_mode<synchronous>, transform_indices = @transform_4, window_bounds = array<i64: 1, 256>}, {pipeline_mode = #tpu.pipeline_mode<synchronous>, transform_indices = @transform_5, window_bounds = array<i64: 256, 128>}, {pipeline_mode = #tpu.pipeline_mode<synchronous>, transform_indices = @transform_6, window_bounds = array<i64: 1, 128>}, {pipeline_mode = #tpu.pipeline_mode<synchronous>, transform_indices = @transform_7, window_bounds = array<i64: 4, 32>}, {transform_indices = @transform_8, window_bounds = array<i64: 4, 128>}]} {
    %c0 = arith.constant 0 : index
    %c0_0 = arith.constant 0 : index
    %0 = vector.load %arg1[%c0, %c0_0] : memref<32x256xbf16, #tpu.memory_space<vmem>>, vector<32x256xbf16>
    %c0_1 = arith.constant 0 : index
    %c0_2 = arith.constant 0 : index
    %1 = vector.load %arg2[%c0_1, %c0_2] : memref<256x512xbf16, #tpu.memory_space<vmem>>, vector<256x512xbf16>
    %cst = arith.constant dense<0.000000e+00> : vector<32x512xf32>
    %2 = tpu.matmul %0, %1, %cst {dimension_numbers = #tpu.dot_dimension_numbers<[1], [0], [0], [1], [0, 0, 1, 1], [], []>} : vector<32x256xbf16>, vector<256x512xbf16>, vector<32x512xf32> -> vector<32x512xf32>
    %c0_3 = arith.constant 0 : index
    %c0_4 = arith.constant 0 : index
    %3 = vector.load %arg3[%c0_3, %c0_4] : memref<1x512xf32, #tpu.memory_space<vmem>>, vector<1x512xf32>
    %4 = vector.broadcast %3 : vector<1x512xf32> to vector<32x512xf32>
    %5 = arith.addf %2, %4 : vector<32x512xf32>
    %cst_5 = arith.constant 0.000000e+00 : f32
    %6 = vector.broadcast %cst_5 : f32 to vector<32x512xf32>
    %7 = arith.cmpf ogt, %5, %6 : vector<32x512xf32>
    %cst_6 = arith.constant 0.00999999977 : f32
    %8 = vector.broadcast %cst_6 : f32 to vector<32x512xf32>
    %9 = arith.mulf %8, %5 : vector<32x512xf32>
    %10 = arith.select %7, %5, %9 : vector<32x512xi1>, vector<32x512xf32>
    %11 = arith.truncf %10 : vector<32x512xf32> to vector<32x512xbf16>
    %c0_7 = arith.constant 0 : index
    %c0_8 = arith.constant 0 : index
    %12 = vector.load %arg4[%c0_7, %c0_8] : memref<512x256xbf16, #tpu.memory_space<vmem>>, vector<512x256xbf16>
    %cst_9 = arith.constant dense<0.000000e+00> : vector<32x256xf32>
    %13 = tpu.matmul %11, %12, %cst_9 {dimension_numbers = #tpu.dot_dimension_numbers<[1], [0], [0], [1], [0, 0, 1, 1], [], []>} : vector<32x512xbf16>, vector<512x256xbf16>, vector<32x256xf32> -> vector<32x256xf32>
    %c0_10 = arith.constant 0 : index
    %c0_11 = arith.constant 0 : index
    %14 = vector.load %arg5[%c0_10, %c0_11] : memref<1x256xf32, #tpu.memory_space<vmem>>, vector<1x256xf32>
    %15 = vector.broadcast %14 : vector<1x256xf32> to vector<32x256xf32>
    %16 = arith.addf %13, %15 : vector<32x256xf32>
    %cst_12 = arith.constant 0.000000e+00 : f32
    %17 = vector.broadcast %cst_12 : f32 to vector<32x256xf32>
    %18 = arith.cmpf ogt, %16, %17 : vector<32x256xf32>
    %cst_13 = arith.constant 0.00999999977 : f32
    %19 = vector.broadcast %cst_13 : f32 to vector<32x256xf32>
    %20 = arith.mulf %19, %16 : vector<32x256xf32>
    %21 = arith.select %18, %16, %20 : vector<32x256xi1>, vector<32x256xf32>
    %22 = arith.truncf %21 : vector<32x256xf32> to vector<32x256xbf16>
    %c0_14 = arith.constant 0 : index
    %c0_15 = arith.constant 0 : index
    %23 = vector.load %arg6[%c0_14, %c0_15] : memref<256x128xbf16, #tpu.memory_space<vmem>>, vector<256x128xbf16>
    %cst_16 = arith.constant dense<0.000000e+00> : vector<32x128xf32>
    %24 = tpu.matmul %22, %23, %cst_16 {dimension_numbers = #tpu.dot_dimension_numbers<[1], [0], [0], [1], [0, 0, 1, 1], [], []>} : vector<32x256xbf16>, vector<256x128xbf16>, vector<32x128xf32> -> vector<32x128xf32>
    %c0_17 = arith.constant 0 : index
    %c0_18 = arith.constant 0 : index
    %25 = vector.load %arg7[%c0_17, %c0_18] : memref<1x128xf32, #tpu.memory_space<vmem>>, vector<1x128xf32>
    %26 = vector.broadcast %25 : vector<1x128xf32> to vector<32x128xf32>
    %27 = arith.addf %24, %26 : vector<32x128xf32>
    %c0_19 = arith.constant 0 : index
    %c0_20 = arith.constant 0 : index
    %28 = vector.load %arg8[%c0_19, %c0_20] : memref<4x32xf32, #tpu.memory_space<vmem>>, vector<4x32xf32>
    %cst_21 = arith.constant dense<0.000000e+00> : vector<4x128xf32>
    %29 = tpu.matmul %28, %27, %cst_21 {dimension_numbers = #tpu.dot_dimension_numbers<[1], [0], [0], [1], [0, 0, 1, 1], [], []>} : vector<4x32xf32>, vector<32x128xf32>, vector<4x128xf32> -> vector<4x128xf32>
    %c0_22 = arith.constant 0 : index
    %c0_23 = arith.constant 0 : index
    %30 = vector.load %arg9[%c0_22, %c0_23] : memref<4x128xf32, #tpu.memory_space<vmem>>, vector<4x128xf32>
    tpu.vector_store %arg9[%c0_22, %c0_23], %29 {strides = array<i32>} : memref<4x128xf32, #tpu.memory_space<vmem>>, vector<4x128xf32>,
    return
  }
  func.func @transform_0(%arg0: i32) -> (i32, i32) {
    %c0_i32 = arith.constant 0 : i32
    %c0_i32_0 = arith.constant 0 : i32
    return %arg0, %c0_i32 : i32, i32
  }
  func.func @transform_1(%arg0: i32) -> (i32, i32) {
    %c0_i32 = arith.constant 0 : i32
    %c0_i32_0 = arith.constant 0 : i32
    %c0_i32_1 = arith.constant 0 : i32
    return %c0_i32, %c0_i32_0 : i32, i32
  }
  func.func @transform_2(%arg0: i32) -> (i32, i32) {
    %c0_i32 = arith.constant 0 : i32
    %c0_i32_0 = arith.constant 0 : i32
    %c0_i32_1 = arith.constant 0 : i32
    return %c0_i32, %c0_i32_0 : i32, i32
  }
  func.func @transform_3(%arg0: i32) -> (i32, i32) {
    %c0_i32 = arith.constant 0 : i32
    %c0_i32_0 = arith.constant 0 : i32
    %c0_i32_1 = arith.constant 0 : i32
    return %c0_i32, %c0_i32_0 : i32, i32
  }
  func.func @transform_4(%arg0: i32) -> (i32, i32) {
    %c0_i32 = arith.constant 0 : i32
    %c0_i32_0 = arith.constant 0 : i32
    %c0_i32_1 = arith.constant 0 : i32
    return %c0_i32, %c0_i32_0 : i32, i32
  }
  func.func @transform_5(%arg0: i32) -> (i32, i32) {
    %c0_i32 = arith.constant 0 : i32
    %c0_i32_0 = arith.constant 0 : i32
    %c0_i32_1 = arith.constant 0 : i32
    return %c0_i32, %c0_i32_0 : i32, i32
  }
  func.func @transform_6(%arg0: i32) -> (i32, i32) {
    %c0_i32 = arith.constant 0 : i32
    %c0_i32_0 = arith.constant 0 : i32
    %c0_i32_1 = arith.constant 0 : i32
    return %c0_i32, %c0_i32_0 : i32, i32
  }
  func.func @transform_7(%arg0: i32) -> (i32, i32) {
    %c0_i32 = arith.constant 0 : i32
    %c0_i32_0 = arith.constant 0 : i32
    %c0_i32_1 = arith.constant 0 : i32
    return %c0_i32, %c0_i32_0 : i32, i32
  }
  func.func @transform_8(%arg0: i32) -> (i32, i32) {
    %c0_i32 = arith.constant 0 : i32
    %c0_i32_0 = arith.constant 0 : i32
    return %arg0, %c0_i32 : i32, i32
  }
}

</mosaic_0001>

<bundles_post_ra>
// kernel: mlp_forward.1
= control target key start
LH: loop header
LB: loop body
LE: loop exit
PB: predicated region body
PF: predicated region fallthrough
CT: control target
= control target key end

     0   :  { %s2494_s0 = inlined_call_operand.vmem [shape: bf16[32,256], index: 0, kind: input, shape index: {}]   ;;  %s2495_s1 = inlined_call_operand.vmem [shape: bf16[256,512], index: 1, kind: input, shape index: {}]   ;;  %s2496_s2 = inlined_call_operand.vmem [shape: f32[1,512], index: 2, kind: input, shape index: {}]   ;;  %s2497_s3 = inlined_call_operand.vmem [shape: bf16[512,256], index: 3, kind: input, shape index: {}]   ;;  %s2498_s4 = inlined_call_operand.vmem [shape: f32[1,256], index: 4, kind: input, shape index: {}]   ;;  %s2499_s5 = inlined_call_operand.vmem [shape: bf16[256,128], index: 5, kind: input, shape index: {}]   ;;  %s2500_s6 = inlined_call_operand.vmem [shape: f32[1,128], index: 6, kind: input, shape index: {}]   ;;  %s2501_s7 = inlined_call_operand.vmem [shape: f32[4,32], index: 7, kind: input, shape index: {}]   ;;  %s2502_s8 = inlined_call_operand.hbm [shape: f32[4,128], index: 8, kind: output, shape index: {}]  }
   0x1   :  { %v1663_v0 = vld [vmem:[%s2495_s1 + $0x4] ss:$16 sps:$4 sm:$0xff]   ;;  %v1665_v1 = vld [vmem:[%s2495_s1] ss:$16 sps:$4 sm:$0xff]   ;;  %v1716_v43 = vld [vmem:[%s2495_s1 + $0xc] ss:$16 sps:$4 sm:$0xff]  }
   0x2   :  { %461 = vmatprep.subr.bf16.mxu1 %v1663_v0  ;;  %v1666_v2 = vld [vmem:[%s2495_s1 + $0x24] ss:$16 sps:$4 sm:$0xff]   ;;  %v1668_v3 = vld [vmem:[%s2495_s1 + $0x20] ss:$16 sps:$4 sm:$0xff]   ;;  %v1714_v44 = vld [vmem:[%s2495_s1 + $0x8] ss:$16 sps:$4 sm:$0xff]  }
   0x3   :  { %462 = vmatpush1.bf16.msra.mxu1 %v1665_v1  ;;  %v1669_v4 = vld [vmem:[%s2495_s1 + $0x44] ss:$16 sps:$4 sm:$0xff]   ;;  %v1671_v5 = vld [vmem:[%s2495_s1 + $0x40] ss:$16 sps:$4 sm:$0xff]   ;;  %v1719_v46 = vld [vmem:[%s2495_s1 + $0x2c] ss:$16 sps:$4 sm:$0xff]  }
   0x4   :  { %463 = vmatprep.subr.bf16.mxu1 %v1666_v2  ;;  %v1672_v6 = vld [vmem:[%s2495_s1 + $0x64] ss:$16 sps:$4 sm:$0xff]   ;;  %v1674_v7 = vld [vmem:[%s2495_s1 + $0x60] ss:$16 sps:$4 sm:$0xff]   ;;  %v1717_v51 = vld [vmem:[%s2495_s1 + $0x28] ss:$16 sps:$4 sm:$0xff]  }
   0x5   :  { %v1675_v8 = vld [vmem:[%s2495_s1 + $0x84] ss:$16 sps:$4 sm:$0xff]   ;;  %v1677_v9 = vld [vmem:[%s2495_s1 + $0x80] ss:$16 sps:$4 sm:$0xff]   ;;  %v1722_v52 = vld [vmem:[%s2495_s1 + $0x4c] ss:$16 sps:$4 sm:$0xff]  }
   0x6   :  { %v1678_v10 = vld [vmem:[%s2495_s1 + $0xa4] ss:$16 sps:$4 sm:$0xff]   ;;  %v1680_v11 = vld [vmem:[%s2495_s1 + $0xa0] ss:$16 sps:$4 sm:$0xff]   ;;  %v1720_v56 = vld [vmem:[%s2495_s1 + $0x48] ss:$16 sps:$4 sm:$0xff]  }
   0x7   :  { %464 = vmatpush1.bf16.msra.mxu1 %v1668_v3  ;;  %v1681_v12 = vld [vmem:[%s2495_s1 + $0xc4] ss:$16 sps:$4 sm:$0xff]   ;;  %v1683_v14 = vld [vmem:[%s2495_s1 + $0xc0] ss:$16 sps:$4 sm:$0xff]   ;;  %v1725_v57 = vld [vmem:[%s2495_s1 + $0x6c] ss:$16 sps:$4 sm:$0xff]  }
   0x8   :  { %465 = vmatprep.subr.bf16.mxu1 %v1669_v4  ;;  %v1992_v13 = vld [vmem:[%s2494_s0 + $0x4] ss:$8 sps:$4 sm:$0xff]   ;;  %v1686_v16 = vld [vmem:[%s2495_s1 + $0xe0] ss:$16 sps:$4 sm:$0xff]   ;;  %v1768_v29 = vld [vmem:[%s2497_s3 + $0x14] ss:$8 sps:$4 sm:$0xff]  }
   0x9   :  { %v1684_v15 = vld [vmem:[%s2495_s1 + $0xe4] ss:$16 sps:$4 sm:$0xff]   ;;  %493 = vmatprep.mubr.bf16.mxu1 %v1992_v13  ;;  %v1689_v18 = vld [vmem:[%s2495_s1 + $0x100] ss:$16 sps:$4 sm:$0xff]   ;;  %v1723_v60 = vld [vmem:[%s2495_s1 + $0x68] ss:$16 sps:$4 sm:$0xff]  }
   0xa   :  { %v1687_v17 = vld [vmem:[%s2495_s1 + $0x104] ss:$16 sps:$4 sm:$0xff]   ;;  %v1692_v20 = vld [vmem:[%s2495_s1 + $0x120] ss:$16 sps:$4 sm:$0xff]   ;;  %v1728_v61 = vld [vmem:[%s2495_s1 + $0x8c] ss:$16 sps:$4 sm:$0xff]  }
   0xb   :  { %466 = vmatpush1.bf16.msra.mxu1 %v1671_v5  ;;  %v1690_v19 = vld [vmem:[%s2495_s1 + $0x124] ss:$16 sps:$4 sm:$0xff]   ;;  %v1695_v22 = vld [vmem:[%s2495_s1 + $0x140] ss:$16 sps:$4 sm:$0xff]   ;;  %v1726_v0 = vld [vmem:[%s2495_s1 + $0x88] ss:$16 sps:$4 sm:$0xff]  }
   0xc   :  { %467 = vmatprep.subr.bf16.mxu1 %v1672_v6  ;;  %v1693_v21 = vld [vmem:[%s2495_s1 + $0x144] ss:$16 sps:$4 sm:$0xff]   ;;  %v1698_v24 = vld [vmem:[%s2495_s1 + $0x160] ss:$16 sps:$4 sm:$0xff]   ;;  %v1731_v1 = vld [vmem:[%s2495_s1 + $0xac] ss:$16 sps:$4 sm:$0xff]  }
   0xd   :  { %v1696_v23 = vld [vmem:[%s2495_s1 + $0x164] ss:$16 sps:$4 sm:$0xff]   ;;  %v1767_v27 = vld [vmem:[%s2497_s3] ss:$8 sps:$4 sm:$0xff]   ;;  %v1770_v31 = vld [vmem:[%s2497_s3 + $0x10] ss:$8 sps:$4 sm:$0xff]  }
   0xe   :  { %v1699_v25 = vld [vmem:[%s2495_s1 + $0x184] ss:$16 sps:$4 sm:$0xff]   ;;  %v1701_v28 = vld [vmem:[%s2495_s1 + $0x180] ss:$16 sps:$4 sm:$0xff]   ;;  %v1729_v4 = vld [vmem:[%s2495_s1 + $0xa8] ss:$16 sps:$4 sm:$0xff]  }
   0xf   :  { %468 = vmatpush1.bf16.msra.mxu1 %v1674_v7  ;;  %v1765_v26 = vld [vmem:[%s2497_s3 + $0x4] ss:$8 sps:$4 sm:$0xff]   ;;  %v1704_v33 = vld [vmem:[%s2495_s1 + $0x1a0] ss:$16 sps:$4 sm:$0xff]   ;;  %v1774_v36 = vld [vmem:[%s2497_s3 + $0x34] ss:$8 sps:$4 sm:$0xff]  }
  0x10   :  { %469 = vmatprep.subr.bf16.mxu1 %v1675_v8  ;;  %v1702_v30 = vld [vmem:[%s2495_s1 + $0x1a4] ss:$16 sps:$4 sm:$0xff]   ;;  %1019 = vmatprep.subr.bf16.mxu0 %v1765_v26  ;;  %v1773_v35 = vld [vmem:[%s2497_s3 + $0x20] ss:$8 sps:$4 sm:$0xff]   ;;  %v1776_v39 = vld [vmem:[%s2497_s3 + $0x30] ss:$8 sps:$4 sm:$0xff]  }
  0x11   :  { %1020 = vmatpush1.bf16.msra.mxu0 %v1767_v27  ;;  %v1771_v32 = vld [vmem:[%s2497_s3 + $0x24] ss:$8 sps:$4 sm:$0xff]   ;;  %v1707_v37 = vld [vmem:[%s2495_s1 + $0x1c0] ss:$16 sps:$4 sm:$0xff]   ;;  %v2099_v47 = vld [vmem:[%s2494_s0 + $0x14] ss:$8 sps:$4 sm:$0xff]  }
  0x12   :  { %1021 = vmatprep.subr.bf16.mxu0 %v1768_v29  ;;  %v1705_v34 = vld [vmem:[%s2495_s1 + $0x1c4] ss:$16 sps:$4 sm:$0xff]   ;;  %v1710_v41 = vld [vmem:[%s2495_s1 + $0x1e0] ss:$16 sps:$4 sm:$0xff]   ;;  %v1734_v5 = vld [vmem:[%s2495_s1 + $0xcc] ss:$16 sps:$4 sm:$0xff]  }
  0x13   :  { %470 = vmatpush1.bf16.msra.mxu1 %v1677_v9  ;;  %v1708_v38 = vld [vmem:[%s2495_s1 + $0x1e4] ss:$16 sps:$4 sm:$0xff]   ;;  %v2082_v42 = vld [vmem:[%s2494_s0] ss:$8 sps:$4 sm:$0xff]   ;;  %v1782_v49 = vld [vmem:[%s2497_s3 + $0x50] ss:$8 sps:$4 sm:$0xff]  }
  0x14   :  { %471 = vmatprep.subr.bf16.mxu1 %v1678_v10  ;;  %v1777_v40 = vld [vmem:[%s2497_s3 + $0x44] ss:$8 sps:$4 sm:$0xff]   ;;  %v1779_v45 = vld [vmem:[%s2497_s3 + $0x40] ss:$8 sps:$4 sm:$0xff]   ;;  %v1780_v48 = vld [vmem:[%s2497_s3 + $0x54] ss:$8 sps:$4 sm:$0xff]  }
  0x15   :  { %1022 = vmatpush1.bf16.msra.mxu0 %v1770_v31  ;;  %v1783_v50 = vld [vmem:[%s2497_s3 + $0x64] ss:$8 sps:$4 sm:$0xff]   ;;  %v1785_v53 = vld [vmem:[%s2497_s3 + $0x60] ss:$8 sps:$4 sm:$0xff]   ;;  %v2124_v54 = vld [vmem:[%s2494_s0 + $0x10] ss:$8 sps:$4 sm:$0xff]  }
  0x16   :  { %1023 = vmatprep.subr.bf16.mxu0 %v1771_v32  ;;  %v1786_v55 = vld [vmem:[%s2497_s3 + $0x74] ss:$8 sps:$4 sm:$0xff]   ;;  %v1788_v58 = vld [vmem:[%s2497_s3 + $0x70] ss:$8 sps:$4 sm:$0xff]   ;;  %v1789_v59 = vld [vmem:[%s2497_s3 + $0x84] ss:$8 sps:$4 sm:$0xff]  }
  0x17   :  { %472 = vmatpush1.bf16.msra.mxu1 %v1680_v11  ;;  %v1791_v62 = vld [vmem:[%s2497_s3 + $0x80] ss:$8 sps:$4 sm:$0xff]   ;;  %v1792_v63 = vld [vmem:[%s2497_s3 + $0x94] ss:$8 sps:$4 sm:$0xff]   ;;  %v1794_v2 = vld [vmem:[%s2497_s3 + $0x90] ss:$8 sps:$4 sm:$0xff]  }
  0x18   :  { %473 = vmatprep.subr.bf16.mxu1 %v1681_v12  ;;  %v1795_v3 = vld [vmem:[%s2497_s3 + $0xa4] ss:$8 sps:$4 sm:$0xff]   ;;  %v1797_v6 = vld [vmem:[%s2497_s3 + $0xa0] ss:$8 sps:$4 sm:$0xff]   ;;  %v1798_v7 = vld [vmem:[%s2497_s3 + $0xb4] ss:$8 sps:$4 sm:$0xff]  }
  0x19   :  { %1024 = vmatpush1.bf16.msra.mxu0 %v1773_v35 }
  0x1a   :  { %1025 = vmatprep.subr.bf16.mxu0 %v1774_v36 }
  0x1b   :  { %474 = vmatpush1.bf16.msra.mxu1 %v1683_v14 }
  0x1c   :  { %475 = vmatprep.subr.bf16.mxu1 %v1684_v15 }
  0x1d   :  { %1026 = vmatpush1.bf16.msra.mxu0 %v1776_v39 }
  0x1e   :  { %1027 = vmatprep.subr.bf16.mxu0 %v1777_v40 }
  0x1f   :  { %476 = vmatpush1.bf16.msra.mxu1 %v1686_v16 }
  0x20   :  { %477 = vmatprep.subr.bf16.mxu1 %v1687_v17 }
  0x21   :  { %1028 = vmatpush1.bf16.msra.mxu0 %v1779_v45 }
  0x22   :  { %1029 = vmatprep.subr.bf16.mxu0 %v1780_v48 }
  0x23   :  { %478 = vmatpush1.bf16.msra.mxu1 %v1689_v18 }
  0x24   :  { %479 = vmatprep.subr.bf16.mxu1 %v1690_v19 }
  0x25   :  { %1030 = vmatpush1.bf16.msra.mxu0 %v1782_v49 }
  0x26   :  { %1031 = vmatprep.subr.bf16.mxu0 %v1783_v50 }
  0x27   :  { %480 = vmatpush1.bf16.msra.mxu1 %v1692_v20 }
  0x28   :  { %481 = vmatprep.subr.bf16.mxu1 %v1693_v21 }
  0x29   :  { %1032 = vmatpush1.bf16.msra.mxu0 %v1785_v53 }
  0x2a   :  { %1033 = vmatprep.subr.bf16.mxu0 %v1786_v55 }
  0x2b   :  { %482 = vmatpush1.bf16.msra.mxu1 %v1695_v22 }
  0x2c   :  { %483 = vmatprep.subr.bf16.mxu1 %v1696_v23 }
  0x2d   :  { %1034 = vmatpush1.bf16.msra.mxu0 %v1788_v58 }
  0x2e   :  { %1035 = vmatprep.subr.bf16.mxu0 %v1789_v59 }
  0x2f   :  { %484 = vmatpush1.bf16.msra.mxu1 %v1698_v24 }
  0x30   :  { %485 = vmatprep.subr.bf16.mxu1 %v1699_v25 }
  0x31   :  { %1036 = vmatpush1.bf16.msra.mxu0 %v1791_v62 }
  0x32   :  { %1037 = vmatprep.subr.bf16.mxu0 %v1792_v63 }
  0x33   :  { %486 = vmatpush1.bf16.msra.mxu1 %v1701_v28 }
  0x34   :  { %487 = vmatprep.subr.bf16.mxu1 %v1702_v30 }
  0x35   :  { %1038 = vmatpush1.bf16.msra.mxu0 %v1794_v2 }
  0x36   :  { %1039 = vmatprep.subr.bf16.mxu0 %v1795_v3 }
  0x37   :  { %488 = vmatpush1.bf16.msra.mxu1 %v1704_v33 }
  0x38   :  { %489 = vmatprep.subr.bf16.mxu1 %v1705_v34 }
  0x3b   :  { %490 = vmatpush1.bf16.msra.mxu1 %v1707_v37 }
  0x3c   :  { %491 = vmatprep.subr.bf16.mxu1 %v1708_v38 }
  0x3f   :  { %492 = vmatpush1.bf16.msra.mxu1 %v1710_v41 }
  0x40   :  { %514 = vmatprep.subr.bf16.mxu1 %v1716_v43 }
  0x42   :  { %494 = vmatmul.mubr.bf16.vlgmr.msra.gmra.mrb[0].mxu1 %v2082_v42 }
  0x43   :  { %515 = vmatpush1.bf16.msra.mxu1 %v1714_v44  ;;  %503 = vmatprep.mubr.bf16.mxu1 %v2099_v47 }
  0x44   :  { %516 = vmatprep.subr.bf16.mxu1 %v1719_v46 }
  0x47   :  { %517 = vmatpush1.bf16.msra.mxu1 %v1717_v51 }
  0x48   :  { %518 = vmatprep.subr.bf16.mxu1 %v1722_v52 }
  0x4a   :  { %504 = vmatmul.mubr.bf16.gmra.mrb[4].mxu1 %v2124_v54 }
  0x4b   :  { %519 = vmatpush1.bf16.msra.mxu1 %v1720_v56  ;;  %546 = vmatprep.mubr.bf16.mxu1 %v1992_v13 }
  0x4c   :  { %520 = vmatprep.subr.bf16.mxu1 %v1725_v57 }
  0x4f   :  { %521 = vmatpush1.bf16.msra.mxu1 %v1723_v60 }
  0x50   :  { %522 = vmatprep.subr.bf16.mxu1 %v1728_v61 }
  0x53   :  { %523 = vmatpush1.bf16.msra.mxu1 %v1726_v0 }
  0x54   :  { %524 = vmatprep.subr.bf16.mxu1 %v1731_v1 }
  0x55   :  { %13 = vsyncpa [#allocation3], 0  ;;  %v1732_v8 = vld [vmem:[%s2495_s1 + $0xc8] ss:$16 sps:$4 sm:$0xff]   ;;  %v1737_v9 = vld [vmem:[%s2495_s1 + $0xec] ss:$16 sps:$4 sm:$0xff]   ;;  %1040 = vmatpush1.bf16.msra.mxu0 %v1797_v6 }
  0x56   :  { %v1800_v10 = vld [vmem:[%s2497_s3 + $0xb0] ss:$8 sps:$4 sm:$0xff]   ;;  %1041 = vmatprep.subr.bf16.mxu0 %v1798_v7  ;;  %v1801_v11 = vld [vmem:[%s2497_s3 + $0xc4] ss:$8 sps:$4 sm:$0xff]   ;;  %v1803_v14 = vld [vmem:[%s2497_s3 + $0xc0] ss:$8 sps:$4 sm:$0xff]  }
  0x57   :  { %525 = vmatpush1.bf16.msra.mxu1 %v1729_v4  ;;  %v1735_v12 = vld [vmem:[%s2495_s1 + $0xe8] ss:$16 sps:$4 sm:$0xff]   ;;  %v1740_v13 = vld [vmem:[%s2495_s1 + $0x10c] ss:$16 sps:$4 sm:$0xff]   ;;  %v2272_v37 = vld [vmem:[%s2499_s5 + $0x40] sm:$0xff]  }
  0x58   :  { %526 = vmatprep.subr.bf16.mxu1 %v1734_v5  ;;  %v1738_v15 = vld [vmem:[%s2495_s1 + $0x108] ss:$16 sps:$4 sm:$0xff]   ;;  %v1743_v16 = vld [vmem:[%s2495_s1 + $0x12c] ss:$16 sps:$4 sm:$0xff]   ;;  %v2277_v38 = vld [vmem:[%s2499_s5] sm:$0xff]  }
  0x59   :  { %1042 = vmatpush1.bf16.msra.mxu0 %v1800_v10  ;;  %v1741_v17 = vld [vmem:[%s2495_s1 + $0x128] ss:$16 sps:$4 sm:$0xff]   ;;  %v1746_v18 = vld [vmem:[%s2495_s1 + $0x14c] ss:$16 sps:$4 sm:$0xff]   ;;  %v2295_v41 = vld [vmem:[%s2499_s5 + $0x50] sm:$0xff]  }
  0x5a   :  { %1043 = vmatprep.subr.bf16.mxu0 %v1801_v11  ;;  %v1744_v19 = vld [vmem:[%s2495_s1 + $0x148] ss:$16 sps:$4 sm:$0xff]   ;;  %v1749_v20 = vld [vmem:[%s2495_s1 + $0x16c] ss:$16 sps:$4 sm:$0xff]   ;;  %v2319_v45 = vld [vmem:[%s2499_s5 + $0x60] sm:$0xff]  }
  0x5b   :  { %527 = vmatpush1.bf16.msra.mxu1 %v1732_v8  ;;  %v1747_v21 = vld [vmem:[%s2495_s1 + $0x168] ss:$16 sps:$4 sm:$0xff]   ;;  %v1752_v22 = vld [vmem:[%s2495_s1 + $0x18c] ss:$16 sps:$4 sm:$0xff]   ;;  %v2326_v46 = vld [vmem:[%s2499_s5 + $0x20] sm:$0xff]  }
  0x5c   :  { %528 = vmatprep.subr.bf16.mxu1 %v1737_v9  ;;  %v1750_v23 = vld [vmem:[%s2495_s1 + $0x188] ss:$16 sps:$4 sm:$0xff]   ;;  %v1758_v24 = vld [vmem:[%s2495_s1 + $0x1ac] ss:$16 sps:$4 sm:$0xff]   ;;  %v2335_v50 = vld [vmem:[%s2496_s2] sm:$0xf] }
  0x5d   :  { %1044 = vmatpush1.bf16.msra.mxu0 %v1803_v14  ;;  %v1756_v25 = vld [vmem:[%s2495_s1 + $0x1a8] ss:$16 sps:$4 sm:$0xff]   ;;  %v1761_v26 = vld [vmem:[%s2495_s1 + $0x1cc] ss:$16 sps:$4 sm:$0xff]  }
  0x5e   :  { %v1759_v27 = vld [vmem:[%s2495_s1 + $0x1c8] ss:$16 sps:$4 sm:$0xff]   ;;  %v1764_v28 = vld [vmem:[%s2495_s1 + $0x1ec] ss:$16 sps:$4 sm:$0xff]  }
  0x5f   :  { %529 = vmatpush1.bf16.msra.mxu1 %v1735_v12  ;;  %v1762_v29 = vld [vmem:[%s2495_s1 + $0x1e8] ss:$16 sps:$4 sm:$0xff]   ;;  %v1804_v30 = vld [vmem:[%s2497_s3 + $0xd4] ss:$8 sps:$4 sm:$0xff]   ;;  %v1807_v32 = vld [vmem:[%s2497_s3 + $0xe4] ss:$8 sps:$4 sm:$0xff]  }
  0x60   :  { %530 = vmatprep.subr.bf16.mxu1 %v1740_v13  ;;  %v1806_v31 = vld [vmem:[%s2497_s3 + $0xd0] ss:$8 sps:$4 sm:$0xff]   ;;  %1045 = vmatprep.subr.bf16.mxu0 %v1804_v30  ;;  %v1809_v33 = vld [vmem:[%s2497_s3 + $0xe0] ss:$8 sps:$4 sm:$0xff]   ;;  %v1810_v34 = vld [vmem:[%s2497_s3 + $0xf4] ss:$8 sps:$4 sm:$0xff]  }
  0x61   :  { %1046 = vmatpush1.bf16.msra.mxu0 %v1806_v31  ;;  %v1812_v35 = vld [vmem:[%s2497_s3 + $0xf0] ss:$8 sps:$4 sm:$0xff]   ;;  %v1815_v36 = vld [vmem:[%s2497_s3 + $0x104] ss:$8 sps:$4 sm:$0xff]   ;;  %v1813_v9 = vld [vmem:[%s2497_s3 + $0x100] ss:$8 sps:$4 sm:$0xff]  }
  0x62   :  { %1047 = vmatprep.subr.bf16.mxu0 %v1807_v32  ;;  %v2282_v39 = vld [vmem:[%s2499_s5 + $0x48] sm:$0xff]   ;;  %v2307_v43 = vld [vmem:[%s2499_s5 + $0x58] sm:$0xff]  }
  0x63   :  { %531 = vmatpush1.bf16.msra.mxu1 %v1738_v15  ;;  %v2290_v40 = vld [vmem:[%s2499_s5 + $0x8] sm:$0xff]   ;;  %v2314_v44 = vld [vmem:[%s2499_s5 + $0x18] sm:$0xff]  }
  0x64   :  { %532 = vmatprep.subr.bf16.mxu1 %v1743_v16  ;;  %v1818_v12 = vld [vmem:[%s2497_s3 + $0x114] ss:$8 sps:$4 sm:$0xff]   ;;  %v1822_v32 = vld [vmem:[%s2497_s3 + $0x130] ss:$8 sps:$4 sm:$0xff]  }
  0x65   :  { %1048 = vmatpush1.bf16.msra.mxu0 %v1809_v33  ;;  %v1824_v31 = vld [vmem:[%s2497_s3 + $0x134] ss:$8 sps:$4 sm:$0xff]   ;;  %v1827_v33 = vld [vmem:[%s2497_s3 + $0x144] ss:$8 sps:$4 sm:$0xff]  }
  0x66   :  { %1049 = vmatprep.subr.bf16.mxu0 %v1810_v34  ;;  %v1825_v34 = vld [vmem:[%s2497_s3 + $0x140] ss:$8 sps:$4 sm:$0xff]  }
  0x67   :  { %533 = vmatpush1.bf16.msra.mxu1 %v1741_v17 }
  0x68   :  { %534 = vmatprep.subr.bf16.mxu1 %v1746_v18 }
  0x69   :  { %1050 = vmatpush1.bf16.msra.mxu0 %v1812_v35  ;;  %v1830_v35 = vld [vmem:[%s2497_s3 + $0x154] ss:$8 sps:$4 sm:$0xff]  }
  0x6a   :  { %1072 = vmatprep.subr.bf16.mxu0 %v1815_v36  ;;  %v1828_v36 = vld [vmem:[%s2497_s3 + $0x150] ss:$8 sps:$4 sm:$0xff]  }
  0x6b   :  { %535 = vmatpush1.bf16.msra.mxu1 %v1744_v19 }
  0x6c   :  { %536 = vmatprep.subr.bf16.mxu1 %v1749_v20  ;;  %v1816_v20 = vld [vmem:[%s2497_s3 + $0x110] ss:$8 sps:$4 sm:$0xff]  }
  0x6f   :  { %537 = vmatpush1.bf16.msra.mxu1 %v1747_v21 }
  0x70   :  { %538 = vmatprep.subr.bf16.mxu1 %v1752_v22 }
  0x73   :  { %539 = vmatpush1.bf16.msra.mxu1 %v1750_v23  ;;  %v1821_v23 = vld [vmem:[%s2497_s3 + $0x124] ss:$8 sps:$4 sm:$0xff]  }
  0x74   :  { %540 = vmatprep.subr.bf16.mxu1 %v1758_v24 }
  0x77   :  { %541 = vmatpush1.bf16.msra.mxu1 %v1756_v25 }
  0x78   :  { %542 = vmatprep.subr.bf16.mxu1 %v1761_v26 }
  0x7b   :  { %543 = vmatpush1.bf16.msra.mxu1 %v1759_v27 }
  0x7c   :  { %544 = vmatprep.subr.bf16.mxu1 %v1764_v28 }
  0x7f   :  { %545 = vmatpush1.bf16.msra.mxu1 %v1762_v29  ;;  %v1819_v29 = vld [vmem:[%s2497_s3 + $0x120] ss:$8 sps:$4 sm:$0xff]  }
  0x80   :  { %1627 = vmatprep.subr.bf16.mxu1 %v2272_v37 }
  0x82   :  { %547 = vmatmul.mubr.bf16.vlgmr.msra.gmra.mrb[8].mxu1 %v2082_v42  ;;  %v2302_v42 = vld [vmem:[%s2499_s5 + $0x10] sm:$0xff]  }
  0x83   :  { %556 = vmatprep.mubr.bf16.mxu1 %v2099_v47  ;;  %1635 = vmatpush3.bf16.msra.mxu1 %v2277_v38  ;;  %v101_v47 = vlaneseq }
  0x84   :  { %1628 = vmatprep.subr.bf16.mxu1 %v2282_v39 }
  0x85   :  { %v2329_v48 = vshrl.u32 %v101_v47, 7  ;;  %v1833_v47 = vld [vmem:[%s2497_s3 + $0x164] ss:$8 sps:$4 sm:$0xff]  }
  0x87   :  { %1636 = vmatpush3.bf16.msra.mxu1 %v2290_v40  ;;  %v103_v49 = vsub.s32 0, %v2329_v48  ;;  %v107_v51 = vsub.s32 1, %v2329_v48 }
  0x88   :  { %1629 = vmatprep.subr.bf16.mxu1 %v2295_v41 }
  0x89   :  { %v104_v52 = vrot.slane %v2335_v50, %v103_v49  ;;  %v108_v53 = vrot.slane %v2335_v50, %v107_v51 }
  0x8a   :  { %557 = vmatmul.mubr.bf16.gmra.mrb[12].mxu1 %v2124_v54 }
  0x8b   :  { %1637 = vmatpush3.bf16.msra.mxu1 %v2302_v42 }
  0x8c   :  { %1630 = vmatprep.subr.bf16.mxu1 %v2307_v43 }
  0x8f   :  { %1638 = vmatpush3.bf16.msra.mxu1 %v2314_v44 }
  0x90   :  { %1631 = vmatprep.subr.bf16.mxu1 %v2319_v45 }
  0x93   :  { %1639 = vmatpush3.bf16.msra.mxu1 %v2326_v46 }
 0x115   :  { %v495_v54 = vpop.f32.mrb[0].mxu1 }
 0x116   :  { %v496_v55 = vadd.f32 %v495_v54, %v104_v52  ;;  %v497_v56 = vpop.f32.mrb[1].mxu1  ;;  %v1834_v54 = vld [vmem:[%s2497_s3 + $0x170] ss:$8 sps:$4 sm:$0xff]  }
 0x117   :  { %v498_v57 = vadd.f32 %v497_v56, %v108_v53  ;;  %v499_v58 = vpop.f32.mrb[2].mxu1  ;;  %v1837_v56 = vld [vmem:[%s2497_s3 + $0x180] ss:$8 sps:$4 sm:$0xff]  }
 0x118   :  { %v583_v59 = vmul.f32 0.01, %v496_v55  ;;  %v500_v60 = vadd.f32 %v499_v58, %v104_v52  ;;  %v501_v61 = vpop.f32.mrb[3].mxu1  ;;  %vm567_vm0 = vcmp.gt.f32.partialorder %v496_v55, 0.0  ;;  %v1840_v58 = vld [vmem:[%s2497_s3 + $0x190] ss:$8 sps:$4 sm:$0xff]  }
 0x119   :  { %v584_v62 = vmul.f32 0.01, %v498_v57  ;;  %v502_v63 = vadd.f32 %v501_v61, %v108_v53  ;;  %vm568_vm2 = vcmp.gt.f32.partialorder %v498_v57, 0.0  ;;  %v1848_v61 = vld [vmem:[%s2497_s3 + $0x1b4] ss:$8 sps:$4 sm:$0xff]  }
 0x11a   :  { %vm571_vm1 = vcmp.gt.f32.partialorder %v500_v60, 0.0  ;;  %v587_v0 = vmul.f32 0.01, %v500_v60  ;;  %v599_v2 = vsel %vm567_vm0, %v496_v55, %v583_v59  ;;  %v1839_v55 = vld [vmem:[%s2497_s3 + $0x184] ss:$8 sps:$4 sm:$0xff]  }
 0x11b   :  { %v588_v1 = vmul.f32 0.01, %v502_v63  ;;  %vm572_vm3 = vcmp.gt.f32.partialorder %v502_v63, 0.0  ;;  %v600_v4 = vsel %vm568_vm2, %v498_v57, %v584_v62  ;;  %v1842_v57 = vld [vmem:[%s2497_s3 + $0x194] ss:$8 sps:$4 sm:$0xff]  }
 0x11c   :  { %v603_v3 = vsel %vm571_vm1, %v500_v60, %v587_v0  ;;  %v1845_v59 = vld [vmem:[%s2497_s3 + $0x1a4] ss:$8 sps:$4 sm:$0xff]   ;;  %v1843_v60 = vld [vmem:[%s2497_s3 + $0x1a0] ss:$8 sps:$4 sm:$0xff]   ;;  %v1846_v62 = vld [vmem:[%s2497_s3 + $0x1b0] ss:$8 sps:$4 sm:$0xff]  }
 0x11d   :  { %v604_v5 = vsel %vm572_vm3, %v502_v63, %v588_v1  ;;  %v615_v6 = vpack.c.bf16 %v603_v3, %v599_v2  ;;  %v505_v7 = vpop.f32.mrb[4].mxu1  ;;  %v1851_v63 = vld [vmem:[%s2497_s3 + $0x1c4] ss:$8 sps:$4 sm:$0xff]   ;;  %v1849_v0 = vld [vmem:[%s2497_s3 + $0x1c0] ss:$8 sps:$4 sm:$0xff]   ;;  %v111_v1 = vsub.s32 2, %v2329_v48 }
 0x11e   :  { %v616_v8 = vpack.c.bf16 %v604_v5, %v600_v4  ;;  %v506_v10 = vadd.f32 %v505_v7, %v104_v52  ;;  %v507_v11 = vpop.f32.mrb[5].mxu1  ;;  %v1854_v2 = vld [vmem:[%s2497_s3 + $0x1d4] ss:$8 sps:$4 sm:$0xff]   ;;  %v115_v3 = vsub.s32 3, %v2329_v48  ;;  %v1852_v5 = vld [vmem:[%s2497_s3 + $0x1d0] ss:$8 sps:$4 sm:$0xff]  }
 0x11f   :  { %v508_v13 = vadd.f32 %v507_v11, %v108_v53  ;;  %v509_v14 = vpop.f32.mrb[6].mxu1  ;;  %v112_v4 = vrot.slane %v2335_v50, %v111_v1  ;;  %v1857_v7 = vld [vmem:[%s2497_s3 + $0x1e4] ss:$8 sps:$4 sm:$0xff]   ;;  %v1855_v11 = vld [vmem:[%s2497_s3 + $0x1e0] ss:$8 sps:$4 sm:$0xff]  }
 0x120   :  { %1051 = vmatprep.mubr.bf16.mxu0 %v616_v8  ;;  %vm575_vm4 = vcmp.gt.f32.partialorder %v506_v10, 0.0  ;;  %v591_v15 = vmul.f32 0.01, %v506_v10  ;;  %v510_v16 = vadd.f32 %v509_v14, %v104_v52  ;;  %v511_v17 = vpop.f32.mrb[7].mxu1  ;;  %v1831_v52 = vld [vmem:[%s2497_s3 + $0x160] ss:$8 sps:$4 sm:$0xff]  }
 0x121   :  { %1052 = vmatmul.mubr.bf16.vlgmr.msra.gmra.mrb[0].mxu0 %v615_v6  ;;  %vm576_vm5 = vcmp.gt.f32.partialorder %v508_v13, 0.0  ;;  %v592_v18 = vmul.f32 0.01, %v508_v13  ;;  %v512_v19 = vadd.f32 %v511_v17, %v108_v53  ;;  %v1836_v53 = vld [vmem:[%s2497_s3 + $0x174] ss:$8 sps:$4 sm:$0xff]   ;;  %v116_v6 = vrot.slane %v2335_v50, %v115_v3 }
 0x122   :  { %1073 = vmatpush1.bf16.msra.mxu0 %v1813_v9  ;;  %vm579_vm6 = vcmp.gt.f32.partialorder %v510_v16, 0.0  ;;  %v595_v21 = vmul.f32 0.01, %v510_v16  ;;  %v607_v22 = vsel %vm575_vm4, %v506_v10, %v591_v15  ;;  %v1860_v14 = vld [vmem:[%s2497_s3 + $0x1f4] ss:$8 sps:$4 sm:$0xff]  }
 0x123   :  { %1074 = vmatprep.subr.bf16.mxu0 %v1818_v12  ;;  %vm580_vm7 = vcmp.gt.f32.partialorder %v512_v19, 0.0  ;;  %v596_v24 = vmul.f32 0.01, %v512_v19  ;;  %v608_v25 = vsel %vm576_vm5, %v508_v13, %v592_v18 }
 0x124   :  { %v611_v26 = vsel %vm579_vm6, %v510_v16, %v595_v21 }
 0x125   :  { %v612_v27 = vsel %vm580_vm7, %v512_v19, %v596_v24  ;;  %v619_v28 = vpack.c.bf16 %v611_v26, %v607_v22 }
 0x126   :  { %1075 = vmatpush1.bf16.msra.mxu0 %v1816_v20  ;;  %v620_v30 = vpack.c.bf16 %v612_v27, %v608_v25  ;;  %v1858_v20 = vld [vmem:[%s2497_s3 + $0x1f0] ss:$8 sps:$4 sm:$0xff]  }
 0x127   :  { %1076 = vmatprep.subr.bf16.mxu0 %v1821_v23 }
 0x128   :  { %1061 = vmatprep.mubr.bf16.mxu0 %v620_v30 }
 0x129   :  { %1062 = vmatmul.mubr.bf16.gmra.mrb[4].mxu0 %v619_v28 }
 0x12a   :  { %1077 = vmatpush1.bf16.msra.mxu0 %v1819_v29 }
 0x12b   :  { %1078 = vmatprep.subr.bf16.mxu0 %v1824_v31 }
 0x12e   :  { %1079 = vmatpush1.bf16.msra.mxu0 %v1822_v32 }
 0x12f   :  { %1080 = vmatprep.subr.bf16.mxu0 %v1827_v33 }
 0x132   :  { %1081 = vmatpush1.bf16.msra.mxu0 %v1825_v34 }
 0x133   :  { %1082 = vmatprep.subr.bf16.mxu0 %v1830_v35 }
 0x136   :  { %1083 = vmatpush1.bf16.msra.mxu0 %v1828_v36 }
 0x137   :  { %1084 = vmatprep.subr.bf16.mxu0 %v1833_v47 }
 0x13a   :  { %1085 = vmatpush1.bf16.msra.mxu0 %v1831_v52 }
 0x13b   :  { %1086 = vmatprep.subr.bf16.mxu0 %v1836_v53 }
 0x13e   :  { %1087 = vmatpush1.bf16.msra.mxu0 %v1834_v54 }
 0x13f   :  { %1088 = vmatprep.subr.bf16.mxu0 %v1839_v55 }
 0x142   :  { %1089 = vmatpush1.bf16.msra.mxu0 %v1837_v56 }
 0x143   :  { %1090 = vmatprep.subr.bf16.mxu0 %v1842_v57 }
 0x146   :  { %1091 = vmatpush1.bf16.msra.mxu0 %v1840_v58 }
 0x147   :  { %1092 = vmatprep.subr.bf16.mxu0 %v1845_v59 }
 0x14a   :  { %1093 = vmatpush1.bf16.msra.mxu0 %v1843_v60 }
 0x14b   :  { %1094 = vmatprep.subr.bf16.mxu0 %v1848_v61 }
 0x14e   :  { %1095 = vmatpush1.bf16.msra.mxu0 %v1846_v62 }
 0x14f   :  { %1096 = vmatprep.subr.bf16.mxu0 %v1851_v63 }
 0x152   :  { %1097 = vmatpush1.bf16.msra.mxu0 %v1849_v0 }
 0x153   :  { %1098 = vmatprep.subr.bf16.mxu0 %v1854_v2 }
 0x155   :  { %v548_v8 = vpop.f32.mrb[8].mxu1 }
 0x156   :  { %v549_v9 = vadd.f32 %v548_v8, %v112_v4  ;;  %v550_v10 = vpop.f32.mrb[9].mxu1  ;;  %1099 = vmatpush1.bf16.msra.mxu0 %v1852_v5 }
 0x157   :  { %v551_v12 = vadd.f32 %v550_v10, %v116_v6  ;;  %v552_v13 = vpop.f32.mrb[10].mxu1  ;;  %1100 = vmatprep.subr.bf16.mxu0 %v1857_v7 }
 0x158   :  { %v585_v50 = vmul.f32 0.01, %v549_v9  ;;  %v553_v15 = vadd.f32 %v552_v13, %v112_v4  ;;  %v554_v16 = vpop.f32.mrb[11].mxu1  ;;  %vm569_vm8 = vcmp.gt.f32.partialorder %v549_v9, 0.0 }
 0x159   :  { %v586_v17 = vmul.f32 0.01, %v551_v12  ;;  %v555_v18 = vadd.f32 %v554_v16, %v116_v6  ;;  %vm570_vm9 = vcmp.gt.f32.partialorder %v551_v12, 0.0 }
 0x15a   :  { %vm573_vm10 = vcmp.gt.f32.partialorder %v553_v15, 0.0  ;;  %v589_v19 = vmul.f32 0.01, %v553_v15  ;;  %1101 = vmatpush1.bf16.msra.mxu0 %v1855_v11  ;;  %v601_v22 = vsel %vm569_vm8, %v549_v9, %v585_v50  ;;  %vm1902_vm8 = vmmov 0  }
 0x15b   :  { %vm574_vm11 = vcmp.gt.f32.partialorder %v555_v18, 0.0  ;;  %v590_v21 = vmul.f32 0.01, %v555_v18  ;;  %1102 = vmatprep.subr.bf16.mxu0 %v1860_v14  ;;  %v602_v26 = vsel %vm570_vm9, %v551_v12, %v586_v17  ;;  %vm1338_vm9 = vcmask 261120  }
 0x15c   :  { %v605_v23 = vsel %vm573_vm10, %v553_v15, %v589_v19 }
 0x15d   :  { %v617_v24 = vpack.c.bf16 %v605_v23, %v601_v22  ;;  %v558_v25 = vpop.f32.mrb[12].mxu1  ;;  %v606_v27 = vsel %vm574_vm11, %v555_v18, %v590_v21 }
 0x15e   :  { %v559_v28 = vadd.f32 %v558_v25, %v112_v4  ;;  %v560_v29 = vpop.f32.mrb[13].mxu1  ;;  %1103 = vmatpush1.bf16.msra.mxu0 %v1858_v20  ;;  %v618_v30 = vpack.c.bf16 %v606_v27, %v602_v26  ;;  %v1901_v27 = vmov 0.0|0.0  }
 0x15f   :  { %v561_v31 = vadd.f32 %v560_v29, %v116_v6  ;;  %v562_v32 = vpop.f32.mrb[14].mxu1  ;;  %1577 = vmatprep.subr.bf16.mxu0 %v2272_v37 }
 0x160   :  { %v593_v33 = vmul.f32 0.01, %v559_v28  ;;  %v563_v34 = vadd.f32 %v562_v32, %v112_v4  ;;  %v564_v35 = vpop.f32.mrb[15].mxu1  ;;  %1104 = vmatprep.mubr.bf16.mxu0 %v618_v30  ;;  %vm577_vm12 = vcmp.gt.f32.partialorder %v559_v28, 0.0 }
 0x161   :  { %v594_v36 = vmul.f32 0.01, %v561_v31  ;;  %v565_v47 = vadd.f32 %v564_v35, %v116_v6  ;;  %1105 = vmatmul.mubr.bf16.vlgmr.msra.gmra.mrb[0].mxu0 %v617_v24  ;;  %vm578_vm13 = vcmp.gt.f32.partialorder %v561_v31, 0.0 }
 0x162   :  { %vm581_vm14 = vcmp.gt.f32.partialorder %v563_v34, 0.0  ;;  %v597_v52 = vmul.f32 0.01, %v563_v34  ;;  %1578 = vmatpush3.bf16.msra.mxu0 %v2277_v38  ;;  %v609_v54 = vsel %vm577_vm12, %v559_v28, %v593_v33  ;;  %v1871_v38 = vld [vmem:[%s2499_s5 + $0x68] sm:$0xff]   ;;  %v1903_v28 = vmov 0.0  }
 0x163   :  { %vm582_vm15 = vcmp.gt.f32.partialorder %v565_v47, 0.0  ;;  %v598_v53 = vmul.f32 0.01, %v565_v47  ;;  %1579 = vmatprep.subr.bf16.mxu0 %v2282_v39  ;;  %v610_v37 = vsel %vm578_vm13, %v561_v31, %v594_v36  ;;  %v1872_v39 = vld [vmem:[%s2499_s5 + $0x28] sm:$0xff]   ;;  %1632 = vmatprep.subr.bf16.mxu1 %v1871_v38  ;;  %v1559_v33 = vld [vmem:[%s2500_s6] ss:$0 sm:$0xff] }
 0x164   :  { %v613_v55 = vsel %vm581_vm14, %v563_v34, %v597_v52  ;;  %1640 = vmatpush3.bf16.msra.mxu1 %v1872_v39  ;;  %s1904_s6 = smov [#allocation2]  }
 0x165   :  { %v614_v56 = vsel %vm582_vm15, %v565_v47, %v598_v53  ;;  %v621_v57 = vpack.c.bf16 %v613_v55, %v609_v54  ;;  %s1419_s25 = sshll.u32 %s1904_s6, 4  ;;  %s1420_s25 = int_to_ptr.vmem [resolvable:$true] %s1419_s25 }
 0x166   :  { %v622_v58 = vpack.c.bf16 %v614_v56, %v610_v37  ;;  %1580 = vmatpush3.bf16.msra.mxu0 %v2290_v40  ;;  %v1873_v40 = vld [vmem:[%s2499_s5 + $0x70] sm:$0xff]   ;;  %s1877_s26 = scalar_lea.vmem %s1420_s25, 64  ;;  %p1882_p1 = scmp.lt.s32.totalorder %s1420_s25, %s1420_s25 }
 0x167   :  { %1581 = vmatprep.subr.bf16.mxu0 %v2295_v41  ;;  %v1874_v41 = vld [vmem:[%s2499_s5 + $0x30] sm:$0xff]   ;;  %1633 = vmatprep.subr.bf16.mxu1 %v1873_v40  ;;  %p1878_p0 = scmp.ne.s32.totalorder %s1420_s25, %s1877_s26  ;;  %p1883_p2 = scmp.lt.s32.totalorder %s1877_s26, %s1877_s26 }
 0x168   :  { %1114 = vmatprep.mubr.bf16.mxu0 %v622_v58  ;;  %1641 = vmatpush3.bf16.msra.mxu1 %v1874_v41 }
 0x169   :  { %1115 = vmatmul.mubr.bf16.gmra.mrb[4].mxu0 %v621_v57  ;;  %p1884_p3 = por %p1883_p2, %p1882_p1 }
 0x16a   :  { %1582 = vmatpush3.bf16.msra.mxu0 %v2302_v42  ;;  %v1875_v42 = vld [vmem:[%s2499_s5 + $0x78] sm:$0xff]  }
 0x16b   :  { %1583 = vmatprep.subr.bf16.mxu0 %v2307_v43  ;;  %v1876_v43 = vld [vmem:[%s2499_s5 + $0x38] sm:$0xff]   ;;  %1634 = vmatprep.subr.bf16.mxu1 %v1875_v42  ;;  %p1885_p4 = pnand %p1884_p3, %p1878_p0 }
 0x16c   :  { %1642 = vmatpush3.bf16.msra.mxu1 %v1876_v43 }
 0x16d   :  { %1621 = vmatprep.subr.bf16.mxu1 %v1901_v27 }
 0x16e   :  { %1584 = vmatpush3.bf16.msra.mxu0 %v2314_v44  ;;  %v687_v44 = vld [vmem:[%s2498_s4] sm:$0x3] }
 0x16f   :  { %1585 = vmatprep.subr.bf16.mxu0 %v2319_v45  ;;  %v692_v45 = vrot.slane %v687_v44, %v103_v49 }
 0x172   :  { %1586 = vmatpush3.bf16.msra.mxu0 %v2326_v46  ;;  %v696_v46 = vrot.slane %v687_v44, %v107_v51 }
 0x173   :  { %1587 = vmatprep.subr.bf16.mxu0 %v1871_v38 }
 0x176   :  { %1588 = vmatpush3.bf16.msra.mxu0 %v1872_v39 }
 0x177   :  { %1589 = vmatprep.subr.bf16.mxu0 %v1873_v40  ;;  %v1337_v40 = vld [vmem:[%s2501_s7] sm:$0xf] }
 0x17a   :  { %1590 = vmatpush3.bf16.msra.mxu0 %v1874_v41 }
 0x17b   :  { %1591 = vmatprep.subr.bf16.mxu0 %v1875_v42 }
 0x17e   :  { %1592 = vmatpush3.bf16.msra.mxu0 %v1876_v43 }
 0x234   :  { %v1106_v59 = vpop.f32.mrb[0].mxu0 }
 0x235   :  { %v1643_v60 = vadd.f32 %v1106_v59, %v692_v45  ;;  %v1108_v61 = vpop.f32.mrb[1].mxu0 }
 0x236   :  { %v1644_v62 = vadd.f32 %v1108_v61, %v696_v46  ;;  %v1110_v63 = vpop.f32.mrb[2].mxu0 }
 0x237   :  { %v1133_v0 = vmul.f32 0.01, %v1643_v60  ;;  %v1645_v1 = vadd.f32 %v1110_v63, %v692_v45  ;;  %v1112_v2 = vpop.f32.mrb[3].mxu0  ;;  %vm1125_vm0 = vcmp.gt.f32.partialorder %v1643_v60, 0.0 }
 0x238   :  { %v1134_v3 = vmul.f32 0.01, %v1644_v62  ;;  %v1646_v4 = vadd.f32 %v1112_v2, %v696_v46  ;;  %vm1126_vm1 = vcmp.gt.f32.partialorder %v1644_v62, 0.0 }
 0x239   :  { %vm1127_vm2 = vcmp.gt.f32.partialorder %v1645_v1, 0.0  ;;  %v1135_v5 = vmul.f32 0.01, %v1645_v1  ;;  %v1141_v49 = vsel %vm1125_vm0, %v1643_v60, %v1133_v0 }
 0x23a   :  { %vm1128_vm3 = vcmp.gt.f32.partialorder %v1646_v4, 0.0  ;;  %v1136_v6 = vmul.f32 0.01, %v1646_v4  ;;  %v1142_v8 = vsel %vm1126_vm1, %v1644_v62, %v1134_v3 }
 0x23b   :  { %v1143_v7 = vsel %vm1127_vm2, %v1645_v1, %v1135_v5 }
 0x23c   :  { %v1149_v48 = vpack.c.bf16 %v1143_v7, %v1141_v49  ;;  %v1116_v51 = vpop.f32.mrb[4].mxu0  ;;  %v1144_v9 = vsel %vm1128_vm3, %v1646_v4, %v1136_v6 }
 0x23d   :  { %v1647_v10 = vadd.f32 %v1116_v51, %v692_v45  ;;  %v1118_v11 = vpop.f32.mrb[5].mxu0  ;;  %v1150_v12 = vpack.c.bf16 %v1144_v9, %v1142_v8 }
 0x23e   :  { %v1648_v13 = vadd.f32 %v1118_v11, %v696_v46  ;;  %v1120_v14 = vpop.f32.mrb[6].mxu0 }
 0x23f   :  { %v1137_v50 = vmul.f32 0.01, %v1647_v10  ;;  %v1649_v15 = vadd.f32 %v1120_v14, %v692_v45  ;;  %v1122_v16 = vpop.f32.mrb[7].mxu0  ;;  %1320 = vmatprep.mubr.bf16.mxu0 %v1150_v12  ;;  %vm1129_vm4 = vcmp.gt.f32.partialorder %v1647_v10, 0.0 }
 0x240   :  { %v1138_v17 = vmul.f32 0.01, %v1648_v13  ;;  %v1650_v18 = vadd.f32 %v1122_v16, %v696_v46  ;;  %1321 = vmatmul.mubr.bf16.vlgmr.msra.gmra.mrb[8].mxu0 %v1149_v48  ;;  %vm1130_vm5 = vcmp.gt.f32.partialorder %v1648_v13, 0.0 }
 0x241   :  { %vm1131_vm6 = vcmp.gt.f32.partialorder %v1649_v15, 0.0  ;;  %v1139_v19 = vmul.f32 0.01, %v1649_v15  ;;  %v1145_v21 = vsel %vm1129_vm4, %v1647_v10, %v1137_v50 }
 0x242   :  { %vm1132_vm7 = vcmp.gt.f32.partialorder %v1650_v18, 0.0  ;;  %v1140_v20 = vmul.f32 0.01, %v1650_v18  ;;  %v1146_v24 = vsel %vm1130_vm5, %v1648_v13, %v1138_v17 }
 0x243   :  { %v1147_v22 = vsel %vm1131_vm6, %v1649_v15, %v1139_v19 }
 0x244   :  { %v1151_v23 = vpack.c.bf16 %v1147_v22, %v1145_v21  ;;  %v1148_v25 = vsel %vm1132_vm7, %v1650_v18, %v1140_v20 }
 0x245   :  { %v1152_v26 = vpack.c.bf16 %v1148_v25, %v1146_v24 }
 0x247   :  { %1328 = vmatprep.mubr.bf16.mxu1 %v1152_v26 }
 0x248   :  { %1329 = vmatmul.mubr.bf16.vlgmr.msra.gmra.mrb[16].mxu1 %v1151_v23 }
 0x249   :  { %1618 = vmatprep.mubr.msk.f32.mxu1 %vm1902_vm8, %v1903_v28 }
 0x313   :  { %v1593_v29 = vpop.f32.mrb[8].mxu0 }
 0x314   :  { %v1594_v30 = vpop.f32.mrb[9].mxu0 }
 0x315   :  { %v1595_v31 = vadd.f32 %v1594_v30, %v1593_v29  ;;  %v1596_v32 = vpop.f32.mrb[10].mxu0 }
 0x316   :  { %v1597_v34 = vpop.f32.mrb[11].mxu0 }
 0x317   :  { %v1598_v35 = vadd.f32 %v1597_v34, %v1596_v32  ;;  %v1323_v36 = vadd.f32 %v1595_v31, %v1559_v33 }
 0x319   :  { %v1326_v47 = vadd.f32 %v1598_v35, %v1559_v33 }
 0x31b   :  { %v1622_v52 = vpack.c.bf16 %v1326_v47, %v1323_v36  ;;  %v1599_v53 = vpop.f32.mrb[16].mxu1 }
 0x31c   :  { %v1600_v54 = vpop.f32.mrb[17].mxu1 }
 0x31d   :  { %v1601_v55 = vadd.f32 %v1600_v54, %v1599_v53  ;;  %v1602_v37 = vpop.f32.mrb[18].mxu1  ;;  %1623 = vmatpush3.bf16.msra.mxu1 %v1622_v52 }
 0x31e   :  { %v1603_v56 = vpop.f32.mrb[19].mxu1  ;;  %1624 = vmatprep.subr.bf16.mxu1 %v1901_v27 }
 0x31f   :  { %v1604_v57 = vadd.f32 %v1603_v56, %v1602_v37  ;;  %v1331_v58 = vadd.f32 %v1601_v55, %v1559_v33 }
 0x321   :  { %v1334_v38 = vadd.f32 %v1604_v57, %v1559_v33 }
 0x323   :  { %v1625_v39 = vpack.c.bf16 %v1334_v38, %v1331_v58 }
 0x325   :  { %1626 = vmatpush3.bf16.msra.mxu1 %v1625_v39 }
 0x328   :  { %1619 = vmatmul.mubr.msk.f32.vlgmr.msra.gmra.mrb[20].mxu1 %vm1338_vm9, %v1337_v40 }
 0x3fb   :  { %v1408_v41 = vpop.f32.mrb[20].mxu1 }
 0x3fc   :  { %1412 = vst [vmem:[#allocation2] sm:$0xf] %v1408_v41  ;;  %v1620_v42 = vpop.f32.mrb[21].mxu1 }
 0x3fd   :  { %1888 = shalt.err (!%p1885_p4)
}
 0x3fe   :  { %s1889_s29 = scalar_lea.hbm %s2502_s8, 64 }
 0x3ff   :  { %p1890_p5 = scmp.ne.s32.totalorder %s2502_s8, %s1889_s29  ;;  %p1893_p6 = scmp.lt.u32.totalorder %s1889_s29, %s2502_s8 }
 0x401   :  { %p1895_p7 = pnand %p1893_p6, %p1890_p5 }
 0x403   :  { %1898 = shalt.err (!%p1895_p7)
}
 0x404   :  { %1422 = dma.vmem_to_hbm [thread:$0]  %s1420_s25, 64, %s2502_s8, [#allocation3]  }
 0x405   :  { %1899 = dma.done.wait [#allocation3], 64  }
 0x406   :  { %1900 = vsyncadd [#allocation3], 4294967232 }
 0x407   :  { %1426 = vsyncpa [#allocation3], 1 }

</bundles_post_ra>
